<compile_context>
chip_gen: v7x
topology: tpu7x:2x2x1
jax: 0.10.0
libtpu: 0.0.40
codegen_flags: <defaults>
</compile_context>

<pallas_src>
import jax
import jax.numpy as jnp
from jax.experimental import pallas as pl
from jax.experimental.pallas import tpu as pltpu


def _se_kernel(x_ref, w1e_ref, w2e_ref, o_ref):
    x = x_ref[...]                                                       # [TB, F*D]
    # Squeeze (mean over D) fused into one tiny MXU matmul, f32 accumulation.
    h = jnp.dot(x, w1e_ref[...], preferred_element_type=jnp.float32)    # [TB, R]
    h = jnp.maximum(h, 0.0)
    # Excitation Linear(R->F)+ReLU, pre-expanded across D (lane-dense result).
    a = jnp.dot(h, w2e_ref[...], preferred_element_type=jnp.float32)    # [TB, F*D]
    a = jnp.maximum(a, 0.0)
    # Re-weight in the input dtype (no f32 up-cast of the big tensor).
    o_ref[...] = (x * a.astype(x.dtype)).astype(o_ref.dtype)


def _round_up(x, m):
    return ((x + m - 1) // m) * m


def _round_down(x, m):
    return max(m, (x // m) * m)


def squeeze_excitation(feature_emb, w1, w2, *, max_tile_b=None):
    """feature_emb: [B, F, D]; w1: [R, F]; w2: [F, R] (nn.Linear (out,in) layout)."""
    B, F, D = feature_emb.shape
    R = w1.shape[0]
    FD = F * D
    dtype = feature_emb.dtype
    itemsize = jnp.dtype(dtype).itemsize
    # Rows per packed sublane tile for this dtype (f32:8, bf16:16, int8/fp8:32).
    pack = {4: 8, 2: 16, 1: 32}.get(itemsize, 8)

    # Grid-invariant weight prep done ONCE in XLA (not per grid step):
    #   W1e[f*D + d, r] = W1[r, f] / D      (fuses the mean over D)
    #   W2e[r, f*D + d] = W2[f, r]          (fuses the broadcast of A over D)
    # Row-major (f, d) flattening matches feature_emb.reshape(B, F*D).
    w1e = (jnp.repeat(w1.T, D, axis=0) / float(D)).astype(dtype)         # [F*D, R]
    w2e = jnp.repeat(w2.T, D, axis=1).astype(jnp.float32)                # [R, F*D]

    x2d = feature_emb.reshape(B, FD)
    # TODO(synk): if FD is not a multiple of 128, output stores become masked
    # (vst.msk); for such configs pad D to a 128-multiple once outside and reuse.

    # --- batch-tile selection ------------------------------------------------
    # Target ~2 MiB per block: large enough to amortize the ~0.35us/step
    # pipeline overhead, small enough that double-buffered in+out (~8 MiB)
    # plus resident weights fits comfortably inside v7x's 64 MiB VMEM.
    target_block_bytes = 2 * 1024 * 1024
    row_bytes = FD * itemsize
    tile_b = max(pack, target_block_bytes // row_bytes)
    if max_tile_b is not None:
        tile_b = min(tile_b, max(pack, max_tile_b))
    tile_b = _round_down(tile_b, pack)
    if B > pack:
        # Keep >=4 grid steps when possible so (a) the pipeline has work to
        # overlap and (b) v7x's two TensorCores both get blocks of the
        # "parallel" batch axis. No effect on single-TC v5e/v6e correctness.
        split_cap = _round_up(pl.cdiv(B, 4), pack)
        tile_b = _round_down(min(tile_b, split_cap), pack)
    if B <= tile_b:
        tile_b = B                 # single full-extent block (legal for any B)
    grid = (pl.cdiv(B, tile_b),)
    # Ragged B: Pallas masks the boundary block. Math is row-wise, so overhang
    # rows only produce overhang rows, which are never stored. No pad/slice.

    block_bytes = tile_b * row_bytes
    weight_bytes = (w1e.size * w1e.dtype.itemsize + w2e.size * w2e.dtype.itemsize)
    vmem_limit = int(min(48 * 1024 * 1024,
                         max(32 * 1024 * 1024,
                             4 * block_bytes + 2 * weight_bytes + (2 << 20))))

    cost = pl.CostEstimate(
        flops=4 * B * FD * R,                               # two tiny matmuls / row
        transcendentals=0,
        bytes_accessed=2 * B * FD * itemsize + weight_bytes,
    )

    out2d = pl.pallas_call(
        _se_kernel,
        out_shape=jax.ShapeDtypeStruct((B, FD), dtype),
        grid=grid,
        in_specs=[
            pl.BlockSpec((tile_b, FD), lambda b: (b, 0)),   # batch-tiled, pipelined
            pl.BlockSpec((FD, R), lambda b: (0, 0)),        # weights VMEM-resident
            pl.BlockSpec((R, FD), lambda b: (0, 0)),
        ],
        out_specs=pl.BlockSpec((tile_b, FD), lambda b: (b, 0)),
        compiler_params=pltpu.CompilerParams(
            dimension_semantics=("parallel",),
            vmem_limit_bytes=vmem_limit,
        ),
        cost_estimate=cost,
    )(x2d, w1e, w2e)

    return out2d.reshape(B, F, D)


def _ref_forward(feature_emb, w1, w2):
    z = jnp.mean(feature_emb, axis=-1)
    h = jnp.maximum(z @ w1.T, 0.0)
    a = jnp.maximum(h @ w2.T, 0.0)
    return feature_emb * a[..., None]


if __name__ == "__main__":
    # Small, module-consistent shapes: batch=2, num_fields=8, embedding_dim=16
    B, F, D = 2, 8, 16
    reduction_ratio = 3
    R = max(1, int(F / reduction_ratio))  # = 2

    key = jax.random.PRNGKey(0)
    kx, k1, k2, kx2 = jax.random.split(key, 4)

    feature_emb = jax.random.normal(kx, (B, F, D), dtype=jnp.float32)
    # Deterministic synthetic weights (nn.Linear layout: (out_features, in_features))
    w1 = jax.random.normal(k1, (R, F), dtype=jnp.float32) * (1.0 / jnp.sqrt(F))
    w2 = jax.random.normal(k2, (F, R), dtype=jnp.float32) * (1.0 / jnp.sqrt(R))

    out = jax.block_until_ready(squeeze_excitation(feature_emb, w1, w2))
    ref = _ref_forward(feature_emb, w1, w2)
    assert out.shape == (B, F, D)
    assert jnp.allclose(out, ref, atol=1e-5, rtol=1e-5), "mismatch vs reference"

    # Ragged-batch check: exercises the masked boundary block (no pad / slice).
    B2 = 70
    x2 = jax.random.normal(kx2, (B2, F, D), dtype=jnp.float32)
    out2 = jax.block_until_ready(squeeze_excitation(x2, w1, w2, max_tile_b=32))
    ref2 = _ref_forward(x2, w1, w2)
    assert out2.shape == (B2, F, D)
    assert jnp.allclose(out2, ref2, atol=1e-5, rtol=1e-5), "ragged-B mismatch"

    print("KERNEL_OK")
</pallas_src>

<mosaic_0001>
module attributes {stable_mosaic.version = 11 : i64} {
  func.func @_se_kernel(%arg0: i32, %arg1: memref<2x128xf32, #tpu.memory_space<vmem>>, %arg2: memref<128x2xf32, #tpu.memory_space<vmem>>, %arg3: memref<2x128xf32, #tpu.memory_space<vmem>>, %arg4: memref<2x128xf32, #tpu.memory_space<vmem>>) attributes {dimension_semantics = [#tpu.dimension_semantics<parallel>], iteration_bounds = array<i64: 1>, scalar_prefetch = 0 : i64, scratch_operands = 0 : i64, tpu.core_type = #tpu.core_type<tc>, window_params = [{transform_indices = @transform_0, window_bounds = array<i64: 2, 128>}, {pipeline_mode = #tpu.pipeline_mode<synchronous>, transform_indices = @transform_1, window_bounds = array<i64: 128, 2>}, {pipeline_mode = #tpu.pipeline_mode<synchronous>, transform_indices = @transform_2, window_bounds = array<i64: 2, 128>}, {transform_indices = @transform_3, window_bounds = array<i64: 2, 128>}]} {
    %c0 = arith.constant 0 : index
    %c0_0 = arith.constant 0 : index
    %0 = vector.load %arg1[%c0, %c0_0] : memref<2x128xf32, #tpu.memory_space<vmem>>, vector<2x128xf32>
    %c0_1 = arith.constant 0 : index
    %c0_2 = arith.constant 0 : index
    %1 = vector.load %arg2[%c0_1, %c0_2] : memref<128x2xf32, #tpu.memory_space<vmem>>, vector<128x2xf32>
    %cst = arith.constant dense<0.000000e+00> : vector<2x2xf32>
    %2 = tpu.matmul %0, %1, %cst {dimension_numbers = #tpu.dot_dimension_numbers<[1], [0], [0], [1], [0, 0, 1, 1], [], []>} : vector<2x128xf32>, vector<128x2xf32>, vector<2x2xf32> -> vector<2x2xf32>
    %cst_3 = arith.constant 0.000000e+00 : f32
    %3 = vector.broadcast %cst_3 : f32 to vector<2x2xf32>
    %4 = arith.maximumf %2, %3 : vector<2x2xf32>
    %c0_4 = arith.constant 0 : index
    %c0_5 = arith.constant 0 : index
    %5 = vector.load %arg3[%c0_4, %c0_5] : memref<2x128xf32, #tpu.memory_space<vmem>>, vector<2x128xf32>
    %cst_6 = arith.constant dense<0.000000e+00> : vector<2x128xf32>
    %6 = tpu.matmul %4, %5, %cst_6 {dimension_numbers = #tpu.dot_dimension_numbers<[1], [0], [0], [1], [0, 0, 1, 1], [], []>} : vector<2x2xf32>, vector<2x128xf32>, vector<2x128xf32> -> vector<2x128xf32>
    %cst_7 = arith.constant 0.000000e+00 : f32
    %7 = vector.broadcast %cst_7 : f32 to vector<2x128xf32>
    %8 = arith.maximumf %6, %7 : vector<2x128xf32>
    %9 = arith.mulf %0, %8 : vector<2x128xf32>
    %c0_8 = arith.constant 0 : index
    %c0_9 = arith.constant 0 : index
    %10 = vector.load %arg4[%c0_8, %c0_9] : memref<2x128xf32, #tpu.memory_space<vmem>>, vector<2x128xf32>
    tpu.vector_store %arg4[%c0_8, %c0_9], %9 {strides = array<i32>} : memref<2x128xf32, #tpu.memory_space<vmem>>, vector<2x128xf32>,
    return
  }
  func.func @transform_0(%arg0: i32) -> (i32, i32) {
    %c0_i32 = arith.constant 0 : i32
    %c0_i32_0 = arith.constant 0 : i32
    return %arg0, %c0_i32 : i32, i32
  }
  func.func @transform_1(%arg0: i32) -> (i32, i32) {
    %c0_i32 = arith.constant 0 : i32
    %c0_i32_0 = arith.constant 0 : i32
    %c0_i32_1 = arith.constant 0 : i32
    return %c0_i32, %c0_i32_0 : i32, i32
  }
  func.func @transform_2(%arg0: i32) -> (i32, i32) {
    %c0_i32 = arith.constant 0 : i32
    %c0_i32_0 = arith.constant 0 : i32
    %c0_i32_1 = arith.constant 0 : i32
    return %c0_i32, %c0_i32_0 : i32, i32
  }
  func.func @transform_3(%arg0: i32) -> (i32, i32) {
    %c0_i32 = arith.constant 0 : i32
    %c0_i32_0 = arith.constant 0 : i32
    return %arg0, %c0_i32 : i32, i32
  }
}

</mosaic_0001>

<bundles_post_ra>
// kernel: tpu_custom_call.1
= control target key start
LH: loop header
LB: loop body
LE: loop exit
PB: predicated region body
PF: predicated region fallthrough
CT: control target
= control target key end

     0   :  { %v312_v3 = vmov 0.0|0.0   ;;  %vm313_vm0 = vmmov 0   ;;  %v314_v6 = vmov 0.0   ;;  %s402_s0 = inlined_call_operand.vmem [shape: f32[2,128], index: 0, kind: input, shape index: {}]   ;;  %s403_s1 = inlined_call_operand.vmem [shape: f32[128,2], index: 1, kind: input, shape index: {}]   ;;  %s404_s2 = inlined_call_operand.vmem [shape: f32[2,128], index: 2, kind: input, shape index: {}]   ;;  %s405_s3 = inlined_call_operand.hbm [shape: f32[2,128], index: 3, kind: output, shape index: {}]  }
   0x1   :  { %v16_v0 = vld [vmem:[%s403_s1] sm:$0xff]  ;;  %v17_v1 = vld [vmem:[%s403_s1 + $0x8] sm:$0xff]  ;;  %v18_v2 = vld [vmem:[%s403_s1 + $0x10] sm:$0xff]  ;;  %260 = vmatprep.subr.bf16.mxu0 %v312_v3  ;;  %252 = vmatprep.mubr.msk.f32.mxu0 %vm313_vm0, %v314_v6 }
   0x2   :  { %v261_v4 = vpack.c.bf16 %v17_v1, %v16_v0  ;;  %v19_v5 = vld [vmem:[%s403_s1 + $0x18] sm:$0xff]  ;;  %255 = vmatprep.subr.mxu1 %v314_v6  ;;  %257 = vmatprep.mubr.msk.f32.mxu1 %vm313_vm0, %v314_v6  ;;  %v20_v8 = vld [vmem:[%s403_s1 + $0x20] sm:$0xff]  ;;  %v21_v9 = vld [vmem:[%s403_s1 + $0x28] sm:$0xff] }
   0x3   :  { %v264_v7 = vpack.c.bf16 %v19_v5, %v18_v2 }
   0x4   :  { %262 = vmatpush3.bf16.msra.mxu0 %v261_v4 }
   0x5   :  { %263 = vmatprep.subr.bf16.mxu0 %v312_v3 }
   0x6   :  { %8 = vsyncpa [#allocation3], 0  ;;  %v267_v10 = vpack.c.bf16 %v21_v9, %v20_v8  ;;  %v22_v11 = vld [vmem:[%s403_s1 + $0x30] sm:$0xff]  ;;  %v23_v12 = vld [vmem:[%s403_s1 + $0x38] sm:$0xff]  ;;  %vm108_vm1 = vcmask 1041408   ;;  %vm104_vm2 = vcmask 15360  }
   0x7   :  { %v270_v13 = vpack.c.bf16 %v23_v12, %v22_v11  ;;  %v24_v14 = vld [vmem:[%s403_s1 + $0x40] sm:$0xff]  ;;  %v25_v15 = vld [vmem:[%s403_s1 + $0x48] sm:$0xff]  ;;  %v26_v17 = vld [vmem:[%s403_s1 + $0x50] sm:$0xff] }
   0x8   :  { %265 = vmatpush3.bf16.msra.mxu0 %v264_v7  ;;  %v273_v16 = vpack.c.bf16 %v25_v15, %v24_v14  ;;  %v27_v18 = vld [vmem:[%s403_s1 + $0x58] sm:$0xff]  ;;  %v28_v20 = vld [vmem:[%s403_s1 + $0x60] sm:$0xff]  ;;  %v29_v21 = vld [vmem:[%s403_s1 + $0x68] sm:$0xff] }
   0x9   :  { %266 = vmatprep.subr.bf16.mxu0 %v312_v3  ;;  %v276_v19 = vpack.c.bf16 %v27_v18, %v26_v17  ;;  %v279_v22 = vpack.c.bf16 %v29_v21, %v28_v20  ;;  %v30_v23 = vld [vmem:[%s403_s1 + $0x70] sm:$0xff]  ;;  %v31_v24 = vld [vmem:[%s403_s1 + $0x78] sm:$0xff]  ;;  %v15_v26 = vld [vmem:[%s402_s0] sm:$0x3]  ;;  %s315_s1 = smov [#allocation2]  }
   0xa   :  { %v282_v25 = vpack.c.bf16 %v31_v24, %v30_v23  ;;  %v103_v27 = vld [vmem:[%s404_s2] sm:$0x3]  ;;  %s191_s21 = sshll.u32 %s315_s1, 4  ;;  %s192_s21 = int_to_ptr.vmem [resolvable:$true] %s191_s21 }
   0xb   :  { %256 = vmatpush3.msk.msra.mxu1 %vm108_vm1, %v103_v27  ;;  %s288_s0 = scalar_lea.vmem %s192_s21, 32  ;;  %p293_p1 = scmp.lt.s32.totalorder %s192_s21, %s192_s21 }
   0xc   :  { %268 = vmatpush3.bf16.msra.mxu0 %v267_v10  ;;  %p289_p0 = scmp.ne.s32.totalorder %s192_s21, %s288_s0  ;;  %p294_p2 = scmp.lt.s32.totalorder %s288_s0, %s288_s0 }
   0xd   :  { %269 = vmatprep.subr.bf16.mxu0 %v312_v3 }
   0xe   :  { %p295_p3 = por %p294_p2, %p293_p1 }
  0x10   :  { %271 = vmatpush3.bf16.msra.mxu0 %v270_v13  ;;  %p296_p4 = pnand %p295_p3, %p289_p0 }
  0x11   :  { %272 = vmatprep.subr.bf16.mxu0 %v312_v3 }
  0x14   :  { %274 = vmatpush3.bf16.msra.mxu0 %v273_v16 }
  0x15   :  { %275 = vmatprep.subr.bf16.mxu0 %v312_v3 }
  0x18   :  { %277 = vmatpush3.bf16.msra.mxu0 %v276_v19 }
  0x19   :  { %278 = vmatprep.subr.bf16.mxu0 %v312_v3 }
  0x1c   :  { %280 = vmatpush3.bf16.msra.mxu0 %v279_v22 }
  0x1d   :  { %281 = vmatprep.subr.bf16.mxu0 %v312_v3 }
  0x20   :  { %283 = vmatpush3.bf16.msra.mxu0 %v282_v25 }
  0x23   :  { %253 = vmatmul.mubr.f32.vlgmr.msra.gmra.mrb[0].mxu0 %v15_v26 }
  0xf6   :  { %v98_v28 = vpop.f32.mrb[0].mxu0 }
  0xf7   :  { %v102_v29 = vmax.f32 %v98_v28, 0.0  ;;  %v254_v30 = vpop.f32.mrb[1].mxu0 }
  0xf9   :  { %258 = vmatmul.mubr.msk.f32.vlgmr.msra.gmra.mrb[0].mxu1 %vm104_vm2, %v102_v29 }
 0x1cc   :  { %v178_v31 = vpop.f32.mrb[0].mxu1 }
 0x1cd   :  { %v182_v32 = vmax.f32 %v178_v31, 0.0  ;;  %v259_v33 = vpop.f32.mrb[1].mxu1 }
 0x1cf   :  { %v183_v34 = vmul.f32 %v182_v32, %v15_v26 }
 0x1d1   :  { %184 = vst [vmem:[#allocation2] sm:$0x3] %v183_v34 }
 0x1d2   :  { %299 = shalt.err (!%p296_p4)
}
 0x1d3   :  { %s300_s23 = scalar_lea.hbm %s405_s3, 32 }
 0x1d4   :  { %p301_p5 = scmp.ne.s32.totalorder %s405_s3, %s300_s23  ;;  %p304_p6 = scmp.lt.u32.totalorder %s300_s23, %s405_s3 }
 0x1d6   :  { %p306_p7 = pnand %p304_p6, %p301_p5 }
 0x1d8   :  { %309 = shalt.err (!%p306_p7)
}
 0x1d9   :  { %194 = dma.vmem_to_hbm [thread:$0]  %s192_s21, 32, %s405_s3, [#allocation3]  }
 0x1da   :  { %310 = dma.done.wait [#allocation3], 32  }
 0x1db   :  { %311 = vsyncadd [#allocation3], 4294967264 }
 0x1dc   :  { %198 = vsyncpa [#allocation3], 1 }

</bundles_post_ra>
